<compile_context>
chip_gen: v7x
topology: tpu7x:2x2x1
jax: 0.10.0
libtpu: 0.0.40
codegen_flags: <defaults>
</compile_context>

<pallas_src>
import functools
import math

import jax
import jax.numpy as jnp
from jax.experimental import pallas as pl
from jax.experimental.pallas import tpu as pltpu


def _cdiv(a, b):
    return -(-a // b)


def _round_up(x, m):
    return _cdiv(x, m) * m


def _pe_kernel(consts_ref, o_ref, *, pack):
    """One (ts, width) tile of the packed PE table.

    consts_ref: (8, width) f32 column-constant vectors
        row 0: pos_off[c]  = c // d_model             (offset within packed row)
        row 1: inv_freq[c] = exp(-ln(1e4) * 2*floor((c % d)/2) / d)
        row 2: odd[c]      = 1.0 if (c % d_model) is odd (cos lane) else 0.0
    o_ref: packed row p holds positions p*pack .. p*pack+pack-1 side by side
           (width = pack*d_model is a multiple of 128 -> lane-dense stores).
    """
    ts, width = o_ref.shape
    pos_off = consts_ref[0:1, :]
    inv_freq = consts_ref[1:2, :]
    odd = consts_ref[2:3, :]

    # Per-step scalar position base for this tile (exact small integer).
    base = (pl.program_id(0) * (ts * pack)).astype(jnp.float32)
    # Per-column position bias, integer-valued f32 -> exact.
    bias = pos_off + base

    # Local packed-row index -> absolute position.  Everything is an exact
    # integer in f32 (< 2^24), so `angle` carries a single rounding and is
    # bit-identical to the reference's `position * div_term`.
    r = jax.lax.broadcasted_iota(jnp.int32, (ts, width), 0).astype(jnp.float32)
    pos = r * jnp.float32(pack) + bias
    angle = pos * inv_freq

    # True cos on the odd lanes (no sin(x + pi/2) phase trick — see header).
    s = jnp.sin(angle)
    c = jnp.cos(angle)
    o_ref[...] = jnp.where(odd > 0.5, c, s)


def _vmem_budget_bytes():
    """Per-output-buffer byte budget + VMEM capacity, with a safe fallback."""
    try:
        vmem_cap = int(pltpu.get_tpu_info().vmem_capacity_bytes)
    except Exception:
        vmem_cap = 64 * 1024 * 1024  # assume the smallest (v7x per-core)
    # v5e/v6e: 128 MiB VMEM -> 8 MiB tiles; v7x: 64 MiB -> 4 MiB tiles.
    budget = (8 << 20) if vmem_cap >= (128 << 20) else (4 << 20)
    return budget, vmem_cap


@functools.lru_cache(maxsize=32)
def _pe_table(length, d_model):
    """Build the (length, 1, d_model) sinusoidal PE table once per shape."""
    assert d_model % 2 == 0, "d_model must be even (same constraint as PyTorch)"

    # Pack `pack` consecutive positions per output row so the last dim is a
    # multiple of 128 (unmasked, lane-dense vst even for small d_model).
    pack = 1 if d_model % 128 == 0 else 128 // math.gcd(d_model, 128)
    width = pack * d_model

    # Column-constant vectors (tiny, computed once), packed into one (8,width)
    # sublane-aligned array -> a single input DMA / double-buffer.
    col = jnp.arange(width, dtype=jnp.int32)
    feat = col % d_model
    pos_off = (col // d_model).astype(jnp.float32)
    pair = (feat - (feat % 2)).astype(jnp.float32)
    inv_freq = jnp.exp(pair * jnp.float32(-math.log(10000.0) / d_model))
    odd = ((feat % 2) == 1).astype(jnp.float32)
    consts = jnp.zeros((8, width), jnp.float32)
    consts = consts.at[0].set(pos_off).at[1].set(inv_freq).at[2].set(odd)

    rows = _cdiv(length, pack)        # packed rows actually needed
    rows_al = _round_up(rows, 8)      # sublane-align the output only
    bytes_per_row = width * 4

    # Tile sizing by bytes (review #3-#6).
    budget, vmem_cap = _vmem_budget_bytes()
    max_ts = max(8, min(rows_al, ((budget // bytes_per_row) // 8) * 8))
    steps = _cdiv(rows_al, max_ts)
    if rows_al > 16 and steps % 2 == 1:
        steps += 1                    # balance v7x's two TensorCores (review #7)
    ts = min(max_ts, max(8, _round_up(_cdiv(rows_al, steps), 8)))
    steps = _cdiv(rows_al, ts)        # guarantees every grid step is non-empty

    cost = pl.CostEstimate(
        flops=int(6 * rows_al * width),
        transcendentals=int(2 * rows_al * width),
        bytes_accessed=int(rows_al * width * 4 + 8 * width * 4),
    )

    pe_packed = pl.pallas_call(
        functools.partial(_pe_kernel, pack=pack),
        out_shape=jax.ShapeDtypeStruct((rows_al, width), jnp.float32),
        grid_spec=pltpu.PrefetchScalarGridSpec(
            num_scalar_prefetch=0,
            grid=(steps,),
            in_specs=[pl.BlockSpec((8, width), lambda i: (0, 0))],
            out_specs=pl.BlockSpec((ts, width), lambda i: (i, 0)),
        ),
        compiler_params=pltpu.CompilerParams(
            dimension_semantics=("parallel",),
            vmem_limit_bytes=int(min(vmem_cap // 2, 32 << 20)),
        ),
        cost_estimate=cost,
    )(consts)

    # Unpack: (rows_al, pack*d_model) -> (rows_al*pack, d_model); drop the
    # (at most 8-row) alignment padding only when actually needed.
    pe = pe_packed.reshape(rows_al * pack, d_model)
    if rows_al * pack != length:
        pe = pe[:length]
    return pe.reshape(length, 1, d_model)


def positional_encoding(x, max_len=None):
    """Equivalent of PositionalEncoding(d_model, max_len).forward(x).

    x: (seq_len, batch, d_model); only seq_len and d_model are used.
    Returns the (seq_len, 1, d_model) float32 positional-encoding slab.
    If max_len is given, the full max_len table is built (and cached) and the
    first seq_len rows are returned, mirroring the PyTorch buffer exactly.
    """
    seq_len, _, d_model = x.shape
    seq_len, d_model = int(seq_len), int(d_model)
    length = seq_len if max_len is None else int(max_len)
    assert seq_len <= length
    pe = _pe_table(length, d_model)
    return pe if length == seq_len else pe[:seq_len]


def _reference(x):
    """Pure-JAX reference mirroring the PyTorch buffer construction."""
    seq_len, _, d_model = x.shape
    position = jnp.arange(seq_len, dtype=jnp.float32)[:, None]
    div_term = jnp.exp(jnp.arange(0, d_model, 2, dtype=jnp.float32)
                       * (-math.log(10000.0) / d_model))
    pe = jnp.zeros((seq_len, d_model), jnp.float32)
    pe = pe.at[:, 0::2].set(jnp.sin(position * div_term))
    pe = pe.at[:, 1::2].set(jnp.cos(position * div_term))
    return pe.reshape(seq_len, 1, d_model)


if __name__ == "__main__":
    key = jax.random.PRNGKey(0)

    # Small shape implied by the module: seq=8, batch=2, d_model=32.
    seq_len, batch, d_model = 8, 2, 32
    x = jax.random.normal(key, (seq_len, batch, d_model), dtype=jnp.float32)
    out = positional_encoding(x)
    jax.block_until_ready(out)
    ref = _reference(x)
    assert out.shape == (seq_len, 1, d_model)
    assert jnp.allclose(out, ref, atol=1e-5, rtol=1e-5)

    # Larger case: multi-step grid, packed layout, alignment-padding path.
    # Angles reach ~300 here, so allow for f32 range-reduction differences
    # between the Pallas and XLA sin/cos implementations (a few ULP of the
    # angle); the angle itself is computed bit-identically to the reference.
    seq_len2, d_model2 = 300, 64
    x2 = jax.random.normal(key, (seq_len2, 3, d_model2), dtype=jnp.float32)
    out2 = positional_encoding(x2)
    jax.block_until_ready(out2)
    ref2 = _reference(x2)
    assert out2.shape == (seq_len2, 1, d_model2)
    assert jnp.allclose(out2, ref2, atol=1e-4, rtol=1e-5)

    print("KERNEL_OK")
</pallas_src>

<mosaic_0001>
module attributes {stable_mosaic.version = 11 : i64} {
  func.func @_pe_kernel(%arg0: i32, %arg1: memref<8x128xf32, #tpu.memory_space<vmem>>, %arg2: memref<8x128xf32, #tpu.memory_space<vmem>>) attributes {dimension_semantics = [#tpu.dimension_semantics<parallel>], iteration_bounds = array<i64: 1>, scalar_prefetch = 0 : i64, scratch_operands = 0 : i64, tpu.core_type = #tpu.core_type<tc>, window_params = [{pipeline_mode = #tpu.pipeline_mode<synchronous>, transform_indices = @transform_0, window_bounds = array<i64: 8, 128>}, {transform_indices = @transform_1, window_bounds = array<i64: 8, 128>}]} {
    %c0 = arith.constant 0 : index
    %c0_0 = arith.constant 0 : index
    %0 = vector.load %arg1[%c0, %c0_0] : memref<8x128xf32, #tpu.memory_space<vmem>>, vector<1x128xf32>
    %c1 = arith.constant 1 : index
    %c0_1 = arith.constant 0 : index
    %1 = vector.load %arg1[%c1, %c0_1] : memref<8x128xf32, #tpu.memory_space<vmem>>, vector<1x128xf32>
    %c2 = arith.constant 2 : index
    %c0_2 = arith.constant 0 : index
    %2 = vector.load %arg1[%c2, %c0_2] : memref<8x128xf32, #tpu.memory_space<vmem>>, vector<1x128xf32>
    %c32_i32 = arith.constant 32 : i32
    %3 = arith.muli %arg0, %c32_i32 : i32
    %4 = arith.sitofp %3 : i32 to f32
    %5 = vector.broadcast %4 : f32 to vector<1x128xf32>
    %6 = arith.addf %0, %5 : vector<1x128xf32>
    %7 = tpu.iota {dimensions = array<i32: 0>} : vector<8x128xi32>
    %8 = arith.sitofp %7 : vector<8x128xi32> to vector<8x128xf32>
    %cst = arith.constant 4.000000e+00 : f32
    %9 = vector.broadcast %cst : f32 to vector<8x128xf32>
    %10 = arith.mulf %8, %9 : vector<8x128xf32>
    %11 = vector.broadcast %6 : vector<1x128xf32> to vector<8x128xf32>
    %12 = arith.addf %10, %11 : vector<8x128xf32>
    %13 = vector.broadcast %1 : vector<1x128xf32> to vector<8x128xf32>
    %14 = arith.mulf %12, %13 : vector<8x128xf32>
    %15 = math.sin %14 : vector<8x128xf32>
    %16 = math.cos %14 : vector<8x128xf32>
    %cst_3 = arith.constant 5.000000e-01 : f32
    %17 = vector.broadcast %cst_3 : f32 to vector<1x128xf32>
    %18 = arith.cmpf ogt, %2, %17 : vector<1x128xf32>
    %19 = vector.shape_cast %18 : vector<1x128xi1> to vector<1x128xi1>
    %20 = vector.broadcast %19 : vector<1x128xi1> to vector<8x128xi1>
    %21 = arith.select %20, %16, %15 : vector<8x128xi1>, vector<8x128xf32>
    %c0_4 = arith.constant 0 : index
    %c0_5 = arith.constant 0 : index
    %22 = vector.load %arg2[%c0_4, %c0_5] : memref<8x128xf32, #tpu.memory_space<vmem>>, vector<8x128xf32>
    tpu.vector_store %arg2[%c0_4, %c0_5], %21 {strides = array<i32>} : memref<8x128xf32, #tpu.memory_space<vmem>>, vector<8x128xf32>,
    return
  }
  func.func @transform_0(%arg0: i32) -> (i32, i32) {
    %c0_i32 = arith.constant 0 : i32
    %c0_i32_0 = arith.constant 0 : i32
    %c0_i32_1 = arith.constant 0 : i32
    return %c0_i32, %c0_i32_0 : i32, i32
  }
  func.func @transform_1(%arg0: i32) -> (i32, i32) {
    %c0_i32 = arith.constant 0 : i32
    %c0_i32_0 = arith.constant 0 : i32
    return %arg0, %c0_i32 : i32, i32
  }
}

</mosaic_0001>

<bundles_post_ra>
// kernel: tpu_custom_call.1
= control target key start
LH: loop header
LB: loop body
LE: loop exit
PB: predicated region body
PF: predicated region fallthrough
CT: control target
= control target key end

     0   :  { %6 = vsyncpa [#allocation3], 0  ;;  %s416_s0 = inlined_call_operand.hbm [shape: f32[8,128], index: 0, kind: input, shape index: {}]   ;;  %s417_s1 = inlined_call_operand.hbm [shape: f32[8,128], index: 1, kind: output, shape index: {}]  }
   0x1   :  { %7 = vsyncpa [#allocation4], 0  ;;  %s348_s6 = smov [#allocation2]   ;;  %s300_s10 = scalar_lea.hbm %s416_s0, 128 }
   0x2   :  { %s14_s7 = sshll.u32 %s348_s6, 4  ;;  %p301_p0 = scmp.ne.s32.totalorder %s416_s0, %s300_s10  ;;  %s15_s7 = int_to_ptr.vmem [resolvable:$true] %s14_s7 }
   0x3   :  { %p304_p1 = scmp.lt.u32.totalorder %s300_s10, %s416_s0 }
   0x5   :  { %p306_p2 = pnand %p304_p1, %p301_p0 }
   0x7   :  { %309 = shalt.err (!%p306_p2)
}
   0x8   :  { %s310_s15 = scalar_lea.vmem %s15_s7, 128  ;;  %p315_p4 = scmp.lt.s32.totalorder %s15_s7, %s15_s7 }
   0x9   :  { %p311_p3 = scmp.ne.s32.totalorder %s15_s7, %s310_s15  ;;  %p316_p5 = scmp.lt.s32.totalorder %s310_s15, %s310_s15 }
   0xb   :  { %p317_p6 = por %p316_p5, %p315_p4 }
   0xd   :  { %p318_p7 = pnand %p317_p6, %p311_p3 }
   0xf   :  { %321 = shalt.err (!%p318_p7)
}
  0x10   :  { %17 = dma.hbm_to_vmem [thread:$0]  %s416_s0, 128, %s15_s7, [#allocation3]  }
  0x11   :  { %344 = dma.done.wait [#allocation3], 128  }
  0x12   :  { %345 = vsyncadd [#allocation3], 4294967168  ;;  %v28_v0 = vlaneseq  ;;  %v273_v4 = vld [vmem:[#allocation2] ss:$0 sm:$0xff]  ;;  %v274_v5 = vld [vmem:[#allocation2 + $0x1] ss:$0 sm:$0xff] }
  0x13   :  { %v349_v19 = vmov 683565275   ;;  %v350_v21 = vmov 2475754826   ;;  %v351_v23 = vmov 2131351028  }
  0x14   :  { %v379_v1 = vshrl.u32 %v28_v0, 7  ;;  %v352_v25 = vmov 2102212464   ;;  %v353_v27 = vmov 920167782   ;;  %s356_s0 = smov [#allocation5]  }
  0x15   :  { %v354_v34 = vmov 1326507024   ;;  %s264_s18 = sshll.u32 %s356_s0, 4  ;;  %s265_s18 = int_to_ptr.vmem [resolvable:$true] %s264_s18 }
  0x16   :  { %v30_v2 = vcvt.s32.f32 %v379_v1  ;;  %s322_s19 = scalar_lea.vmem %s265_s18, 128  ;;  %p327_p9 = scmp.lt.s32.totalorder %s265_s18, %s265_s18 }
  0x17   :  { %p323_p8 = scmp.ne.s32.totalorder %s265_s18, %s322_s19  ;;  %p328_p10 = scmp.lt.s32.totalorder %s322_s19, %s322_s19 }
  0x18   :  { %v31_v3 = vmul.f32 4.0, %v30_v2 }
  0x19   :  { %p329_p11 = por %p328_p10, %p327_p9 }
  0x1a   :  { %v36_v6 = vadd.f32 %v273_v4, %v31_v3 }
  0x1b   :  { %p330_p12 = pnand %p329_p11, %p323_p8 }
  0x1c   :  { %v382_v7 = vmul.f32 %v274_v5, %v36_v6 }
  0x1e   :  { %v45_v8 = vand.u32 2139095040, %v382_v7  ;;  %v42_v10 = vand.u32 2147483647, %v382_v7  ;;  %vm44_vm7 = vcmp.lt.s32.totalorder %v382_v7, 0 }
  0x20   :  { %v46_v9 = vshrl.u32 %v45_v8, 23  ;;  %v49_v13 = vand.u32 8388607, %v42_v10  ;;  %vm43_vm8 = vcmp.le.f32.partialorder %v42_v10, 0.7853982 }
  0x22   :  { %v275_v11 = vadd.s32 4294967169, %v46_v9  ;;  %v50_v16 = vor.u32 8388608, %v49_v13 }
  0x24   :  { %v52_v12 = vadd.s32 1, %v275_v11  ;;  %v90_v36 = vshll.u32 %v50_v16, 8 }
  0x26   :  { %vm53_vm0 = vcmp.gt.s32.totalorder %v52_v12, 0 }
  0x27   :  { %v54_v14 = vsel %vm53_vm0, %v52_v12, 0  ;;  %vm134_vm0 = vweird.f32 %v382_v7 }
  0x28   :  { %v56_v15 = vand.u32 31, %v54_v14  ;;  %v55_v17 = vshrl.u32 %v54_v14, 5 }
  0x2a   :  { %v57_v18 = vsub.s32 32, %v56_v15  ;;  %v59_v20 = vshll.u32 %v349_v19, %v56_v15  ;;  %v62_v22 = vshll.u32 %v350_v21, %v56_v15  ;;  %v65_v24 = vshll.u32 %v351_v23, %v56_v15 }
  0x2b   :  { %v68_v26 = vshll.u32 %v352_v25, %v56_v15  ;;  %v71_v28 = vshll.u32 %v353_v27, %v56_v15  ;;  %vm74_vm1 = vcmp.lt.s32.totalorder %v55_v17, 1  ;;  %vm77_vm2 = vcmp.lt.s32.totalorder %v55_v17, 4 }
  0x2c   :  { %v58_v29 = vshrl.u32 %v349_v19, %v57_v18  ;;  %v60_v30 = vshrl.u32 %v350_v21, %v57_v18  ;;  %v63_v31 = vshrl.u32 %v351_v23, %v57_v18  ;;  %v66_v32 = vshrl.u32 %v352_v25, %v57_v18 }
  0x2d   :  { %v69_v33 = vshrl.u32 %v353_v27, %v57_v18  ;;  %v72_v35 = vshrl.u32 %v354_v34, %v57_v18  ;;  %vm75_vm3 = vcmp.lt.s32.totalorder %v55_v17, 2  ;;  %vm76_vm4 = vcmp.lt.s32.totalorder %v55_v17, 3 }
  0x2e   :  { %v61_v37 = vor.u32 %v60_v30, %v59_v20  ;;  %v64_v38 = vor.u32 %v63_v31, %v62_v22  ;;  %v67_v39 = vor.u32 %v66_v32, %v65_v24  ;;  %v253_v32 = vsub.s32 0, %v379_v1 }
  0x2f   :  { %v70_v40 = vor.u32 %v69_v33, %v68_v26  ;;  %v73_v41 = vor.u32 %v72_v35, %v71_v28  ;;  %v23_v28 = vld [vmem:[#allocation2 + $0x2] sm:$0x1]  ;;  %v355_v33 = vmov 0  }
  0x30   :  { %v78_v42 = vsel %vm74_vm1, %v58_v29, %v61_v37  ;;  %v79_v43 = vsel %vm77_vm2, %v67_v39, 2102212464  ;;  %v82_v44 = vsel %vm74_vm1, %v61_v37, %v64_v38  ;;  %v86_v45 = vsel %vm74_vm1, %v64_v38, %v67_v39 }
  0x31   :  { %v80_v46 = vsel %vm76_vm4, %v64_v38, %v79_v43  ;;  %v83_v47 = vsel %vm77_vm2, %v70_v40, 920167782  ;;  %v87_v48 = vsel %vm77_vm2, %v73_v41, 1326507024  ;;  %vm249_vm9 = vcmp.gt.f32.partialorder %v23_v28, 0.5 }
  0x32   :  { %v84_v49 = vsel %vm76_vm4, %v67_v39, %v83_v47  ;;  %v88_v50 = vsel %vm76_vm4, %v70_v40, %v87_v48  ;;  %v81_v51 = vsel %vm75_vm3, %v78_v42, %v80_v46  ;;  %v250_v34 = vsel %vm249_vm9, 1, %v355_v33 }
  0x33   :  { %v85_v52 = vsel %vm75_vm3, %v82_v44, %v84_v49  ;;  %v89_v53 = vsel %vm75_vm3, %v86_v45, %v88_v50  ;;  %v97_v58 = vmul.u32 %v90_v36, %v81_v51  ;;  %v254_v10 = vrot.slane %v250_v34, %v253_v32 }
  0x34   :  { %v388_v54 = vmul.u32.u64.low %v90_v36, %v89_v53  ;;  %v389_v55 = vmul.u32.u64.high %v90_v36, %v89_v53, %v388_v54  ;;  %v391_v56 = vmul.u32.u64.low %v90_v36, %v85_v52  ;;  %v392_v57 = vmul.u32.u64.high %v90_v36, %v85_v52, %v391_v56 }
  0x35   :  { %vm255_vm1 = vcmp.eq.s32.totalorder %v254_v10, 1 }
  0x36   :  { %vm99_vm5 = vc.u32 %v389_v55, %v391_v56  ;;  %v100_v59 = vadd.s32 1, %v392_v57  ;;  %v98_v8 = vadd.s32 %v391_v56, %v389_v55 }
  0x38   :  { %v101_v60 = vsel %vm99_vm5, %v100_v59, %v392_v57 }
  0x39   :  { %v102_v61 = vadd.s32 %v101_v60, %v97_v58 }
  0x3b   :  { %v103_v62 = vadd.s32 536870912, %v102_v61 }
  0x3d   :  { %v104_v63 = vshrl.u32 %v103_v62, 30 }
  0x3f   :  { %v105_v0 = vshll.u32 %v104_v63, 30  ;;  %v128_v21 = vsub.s32 4, %v104_v63 }
  0x41   :  { %v106_v2 = vsub.s32 %v102_v61, %v105_v0  ;;  %v129_v24 = vsel %vm44_vm7, %v128_v21, %v104_v63 }
  0x42   :  { %v131_v27 = vsel %vm43_vm8, 0, %v129_v24 }
  0x43   :  { %v108_v3 = vsub.s32 0, %v106_v2  ;;  %v135_v29 = vadd.s32 3, %v131_v27  ;;  %v239_v31 = vand.u32 3, %v131_v27 }
  0x45   :  { %v276_v4 = vmin.u32 %v108_v3, %v106_v2  ;;  %v136_v30 = vand.u32 3, %v135_v29  ;;  %vm244_vm11 = vcmp.eq.s32.totalorder %v239_v31, 2  ;;  %vm241_vm13 = vcmp.eq.s32.totalorder %v239_v31, 0 }
  0x46   :  { %vm240_vm15 = vcmp.lt.s32.totalorder %v239_v31, 2 }
  0x47   :  { %v110_v5 = vclz %v276_v4  ;;  %vm141_vm10 = vcmp.eq.s32.totalorder %v136_v30, 2  ;;  %vm138_vm12 = vcmp.eq.s32.totalorder %v136_v30, 0  ;;  %vm137_vm14 = vcmp.lt.s32.totalorder %v136_v30, 2 }
  0x49   :  { %v277_v6 = vadd.s32 4294967294, %v110_v5 }
  0x4b   :  { %vm278_vm6 = vcmp.lt.s32.totalorder %v277_v6, 0 }
  0x4c   :  { %v113_v9 = vsel %vm278_vm6, 0, %v277_v6 }
  0x4d   :  { %v114_v11 = vsub.s32 32, %v113_v9  ;;  %v115_v12 = vshll.u32 %v106_v2, %v113_v9  ;;  %v118_v13 = vsub.s32 4294967266, %v113_v9 }
  0x4f   :  { %v116_v14 = vshrl.u32 %v98_v8, %v114_v11  ;;  %v119_v15 = vadd.s32 127, %v118_v13 }
  0x51   :  { %v117_v16 = vor.u32 %v116_v14, %v115_v12  ;;  %v120_v17 = vshll.u32 %v119_v15, 23 }
  0x53   :  { %v121_v18 = vor.u32 4788187, %v120_v17  ;;  %v124_v19 = vcvt.s32.f32 %v117_v16 }
  0x55   :  { %v122_v20 = vand.u32 2147483647, %v121_v18 }
  0x57   :  { %v125_v22 = vmul.f32 %v124_v19, %v122_v20 }
  0x59   :  { %v126_v23 = vxor.u32 2147483648, %v125_v22 }
  0x5b   :  { %v127_v25 = vsel %vm44_vm7, %v126_v23, %v125_v22 }
  0x5c   :  { %v130_v26 = vsel %vm43_vm8, %v382_v7, %v127_v25 }
  0x5d   :  { %296 = vcosq.f32 %v130_v26 }
  0x5e   :  { %298 = vsinq.f32 %v130_v26 }
  0x67   :  { %v297_v35 = vpop.eup %296 }
  0x68   :  { %v299_v36 = vpop.eup %298  ;;  %v142_v37 = vxor.u32 2147483648, %v297_v35 }
  0x69   :  { %v139_v38 = vxor.u32 2147483648, %v299_v36 }
  0x6a   :  { %v143_v39 = vsel %vm141_vm10, %v142_v37, %v299_v36  ;;  %v246_v40 = vsel %vm244_vm11, %v142_v37, %v299_v36 }
  0x6b   :  { %v140_v1 = vsel %vm138_vm12, %v297_v35, %v139_v38  ;;  %v243_v41 = vsel %vm241_vm13, %v297_v35, %v139_v38 }
  0x6c   :  { %v144_v42 = vsel %vm137_vm14, %v140_v1, %v143_v39  ;;  %v247_v43 = vsel %vm240_vm15, %v243_v41, %v246_v40 }
  0x6d   :  { %v145_v44 = vsel %vm134_vm0, nan, %v144_v42  ;;  %v248_v45 = vsel %vm134_vm0, nan, %v247_v43 }
  0x6e   :  { %v256_v46 = vsel %vm255_vm1, %v248_v45, %v145_v44 }
  0x6f   :  { %257 = vst [vmem:[#allocation5] sm:$0xff] %v256_v46 }
  0x70   :  { %333 = shalt.err (!%p330_p12)
}
  0x71   :  { %s334_s22 = scalar_lea.hbm %s417_s1, 128 }
  0x72   :  { %p335_p13 = scmp.ne.s32.totalorder %s417_s1, %s334_s22  ;;  %p338_p0 = scmp.lt.u32.totalorder %s334_s22, %s417_s1 }
  0x74   :  { %p340_p1 = pnand %p338_p0, %p335_p13 }
  0x76   :  { %343 = shalt.err (!%p340_p1)
}
  0x77   :  { %267 = dma.vmem_to_hbm [thread:$0]  %s265_s18, 128, %s417_s1, [#allocation4]  }
  0x78   :  { %346 = dma.done.wait [#allocation4], 128  }
  0x79   :  { %347 = vsyncadd [#allocation4], 4294967168 }
  0x7a   :  { %271 = vsyncpa [#allocation3], 1 }
  0x7b   :  { %272 = vsyncpa [#allocation4], 1 }

</bundles_post_ra>
